<compile_context>
chip_gen: v7x
topology: tpu7x:2x2x1
jax: 0.10.0
libtpu: 0.0.40
codegen_flags: <defaults>
</compile_context>

<pallas_src>
import functools

import jax
import jax.numpy as jnp
from jax.experimental import pallas as pl
from jax.experimental.pallas import tpu as pltpu

LN_EPS = 1e-5
_SQRT_2_OVER_PI = 0.7978845608028654
_GELU_C = 0.044715
_INV_SQRT2 = 0.7071067811865476


# ----------------------------- kernel helpers ------------------------------

def _gelu_tanh(x):
    # tanh-approximate GELU: transcendental goes to the EUP slot (free-ish)
    # instead of a long erf polynomial on the saturating VALU slot.
    x3 = x * x * x
    return 0.5 * x * (1.0 + jnp.tanh(_SQRT_2_OVER_PI * (x + _GELU_C * x3)))


def _ln_gelu(h_f32, gamma, beta, ew_dtype):
    """Fused LayerNorm (f32 statistics, single pass) -> affine + GELU in
    ew_dtype (bf16 on v6e/v7x, f32 on v5e). Returns bf16 for the next MXU op."""
    n = h_f32.shape[-1]
    s = jnp.sum(h_f32, axis=-1, keepdims=True)
    sq = jnp.sum(h_f32 * h_f32, axis=-1, keepdims=True)
    mean = s * (1.0 / n)
    var = jnp.maximum(sq * (1.0 / n) - mean * mean, 0.0)
    inv = jax.lax.rsqrt(var + LN_EPS)
    hc = (h_f32 - mean).astype(ew_dtype)
    scale = inv.astype(ew_dtype) * gamma          # (TB,1) * (1,H) broadcast
    y = hc * scale + beta
    return _gelu_tanh(y).astype(jnp.bfloat16)


# --------------------------------- kernel ----------------------------------

def spatial_detector_kernel(
    x_ref,                    # [TB, D_in]  original dtype (cast in-kernel)
    w1_ref, b1_ref,           # [D_in, H] bf16, [1, H] f32
    g1_ref, be1_ref,          # [1, H] ew_dtype
    w2_ref, b2_ref,           # [H, H] bf16, [1, H] f32
    g2_ref, be2_ref,          # [1, H] ew_dtype
    w3_ref, b3_ref,           # [H, 3] bf16, [1, 3] f32
    *rest,                    # [hist_ref,] out_ref
    alpha, ew_dtype,          # static
):
    if alpha == 1.0:
        (out_ref,) = rest
        hist_ref = None
    else:
        hist_ref, out_ref = rest

    # fc1 -> ln1 -> gelu   (bf16 MXU operands, f32 accumulation)
    x = x_ref[...].astype(jnp.bfloat16)
    h = jnp.dot(x, w1_ref[...], preferred_element_type=jnp.float32) + b1_ref[...]
    h = _ln_gelu(h, g1_ref[...], be1_ref[...], ew_dtype)

    # fc2 -> ln2 -> gelu
    h = jnp.dot(h, w2_ref[...], preferred_element_type=jnp.float32) + b2_ref[...]
    h = _ln_gelu(h, g2_ref[...], be2_ref[...], ew_dtype)

    # fc3 -> softmax over the 3 mode logits (f32 throughout, tiny)
    logits = jnp.dot(h, w3_ref[...], preferred_element_type=jnp.float32) + b3_ref[...]
    m = jnp.max(logits, axis=-1, keepdims=True)
    e = jnp.exp(logits - m)
    denom = jnp.sum(e, axis=-1, keepdims=True)
    r = pl.reciprocal(denom, approx=True)      # EUP slot
    r = r * (2.0 - denom * r)                  # one Newton step -> ~f32 accurate
    probs = e * r

    if hist_ref is None:
        out_ref[...] = probs
    else:
        out_ref[...] = alpha * probs + (1.0 - alpha) * hist_ref[...]


# -------------------------------- wrapper -----------------------------------

def _round_up(x, m):
    return (x + m - 1) // m * m


def _elementwise_dtype():
    """bf16 VPU/EUP exists on v6e/v7x; v5e (and older) must stay f32."""
    try:
        kind = jax.devices()[0].device_kind.lower()
    except Exception:
        return jnp.float32
    if ("v6" in kind) or ("v7" in kind):
        return jnp.bfloat16
    return jnp.float32


def spatial_detector_forward(params, x, history_probs=None, *, block_b=1024):
    """Pure-functional forward. Returns mode_probs [B, 3] (also the new history)."""
    B, D_in = x.shape
    H = params["w1"].shape[1]

    alpha = 1.0 if history_probs is None else 0.8
    ew_dtype = _elementwise_dtype()

    # Batch tile:
    #  * multiple of 16 rows (bf16 sublane packing of intermediate h),
    #  * >= 2 grid tiles when B allows it (v7x megacore actually shards),
    #  * capped so the double-buffered x tile stays well inside VMEM,
    #  * no wrapper-side padding: Pallas pads/masks the partial last tile
    #    (rows are independent, tail rows are never written back).
    TB = min(block_b, max(16, _round_up(pl.cdiv(B, 2), 16)))
    bytes_per_row = D_in * jnp.dtype(x.dtype).itemsize
    vmem_cap_rows = max(16, ((8 << 20) // max(bytes_per_row, 1)) // 16 * 16)
    TB = min(TB, vmem_cap_rows)
    num_tiles = pl.cdiv(B, TB)

    # MXU operands in bf16; LN affine params in the elementwise dtype;
    # matmul biases stay f32 (added to the f32 accumulator).
    w1 = params["w1"].astype(jnp.bfloat16)
    w2 = params["w2"].astype(jnp.bfloat16)
    w3 = params["w3"].astype(jnp.bfloat16)
    g1 = params["g1"].astype(ew_dtype)
    be1 = params["be1"].astype(ew_dtype)
    g2 = params["g2"].astype(ew_dtype)
    be2 = params["be2"].astype(ew_dtype)

    def const(shape, nbytes=0):
        # Constant block index -> Pallas never re-DMAs across grid steps.
        # Single-buffer only very large resident weights (big D_in) so the
        # default double-buffering doesn't double their VMEM footprint.
        if nbytes > (1 << 20):
            return pl.BlockSpec(shape, lambda i: (0, 0),
                                pipeline_mode=pl.Buffered(1))
        return pl.BlockSpec(shape, lambda i: (0, 0))

    in_specs = [
        pl.BlockSpec((TB, D_in), lambda i: (i, 0)),        # x
        const((D_in, H), w1.size * 2), const((1, H)),      # w1, b1
        const((1, H)), const((1, H)),                      # g1, be1
        const((H, H), w2.size * 2), const((1, H)),         # w2, b2
        const((1, H)), const((1, H)),                      # g2, be2
        const((H, 3)), const((1, 3)),                      # w3, b3
    ]
    args = [x,
            w1, params["b1"], g1, be1,
            w2, params["b2"], g2, be2,
            w3, params["b3"]]

    if history_probs is not None:
        in_specs.append(pl.BlockSpec((TB, 3), lambda i: (i, 0)))
        args.append(history_probs.astype(jnp.float32))

    cost = pl.CostEstimate(
        flops=2 * B * (D_in * H + H * H + H * 3),
        transcendentals=B * (2 * H + 3 + 2 + 1),   # tanh x2H, exp x3, rsqrt x2, recip
        bytes_accessed=(B * D_in * jnp.dtype(x.dtype).itemsize
                        + (w1.size + w2.size + w3.size) * 2
                        + (6 * H + 3) * 4
                        + (B * 3 * 4 if history_probs is not None else 0)
                        + B * 3 * 4),
    )

    return pl.pallas_call(
        functools.partial(spatial_detector_kernel, alpha=alpha, ew_dtype=ew_dtype),
        out_shape=jax.ShapeDtypeStruct((B, 3), jnp.float32),
        grid=(num_tiles,),
        in_specs=in_specs,
        out_specs=pl.BlockSpec((TB, 3), lambda i: (i, 0)),
        compiler_params=pltpu.CompilerParams(
            dimension_semantics=("parallel",)),            # v7x: 2 TCs share batch
        cost_estimate=cost,
    )(*args)


# ------------------------------ params / refs --------------------------------

def init_params(key, input_size, hidden_size=128):
    """Deterministic parameter init. Linear weights stored as [in, out]."""
    ks = jax.random.split(key, 6)

    def linear(kw, kb, fan_in, fan_out):
        bound = 1.0 / jnp.sqrt(float(fan_in))
        w = jax.random.uniform(kw, (fan_in, fan_out), jnp.float32, -bound, bound)
        b = jax.random.uniform(kb, (1, fan_out), jnp.float32, -bound, bound)
        return w, b

    w1, b1 = linear(ks[0], ks[1], input_size, hidden_size)
    w2, b2 = linear(ks[2], ks[3], hidden_size, hidden_size)
    w3, b3 = linear(ks[4], ks[5], hidden_size, 3)
    return {
        "w1": w1, "b1": b1,
        "g1": jnp.ones((1, hidden_size), jnp.float32),
        "be1": jnp.zeros((1, hidden_size), jnp.float32),
        "w2": w2, "b2": b2,
        "g2": jnp.ones((1, hidden_size), jnp.float32),
        "be2": jnp.zeros((1, hidden_size), jnp.float32),
        "w3": w3, "b3": b3,
    }


def _reference_matched(params, x, history_probs, ew_dtype):
    """Pure-JAX reference mirroring the kernel numerics (bf16 MXU operands,
    f32 LN stats, tanh GELU in ew_dtype)."""
    def ln_gelu(h, g, b):
        n = h.shape[-1]
        mean = jnp.sum(h, -1, keepdims=True) * (1.0 / n)
        var = jnp.maximum(jnp.sum(h * h, -1, keepdims=True) * (1.0 / n)
                          - mean * mean, 0.0)
        inv = jax.lax.rsqrt(var + LN_EPS)
        y = ((h - mean).astype(ew_dtype)
             * (inv.astype(ew_dtype) * g.astype(ew_dtype))
             + b.astype(ew_dtype))
        y3 = y * y * y
        y = 0.5 * y * (1.0 + jnp.tanh(_SQRT_2_OVER_PI * (y + _GELU_C * y3)))
        return y.astype(jnp.bfloat16)

    h = jnp.dot(x.astype(jnp.bfloat16), params["w1"].astype(jnp.bfloat16),
                preferred_element_type=jnp.float32) + params["b1"]
    h = ln_gelu(h, params["g1"], params["be1"])
    h = jnp.dot(h, params["w2"].astype(jnp.bfloat16),
                preferred_element_type=jnp.float32) + params["b2"]
    h = ln_gelu(h, params["g2"], params["be2"])
    logits = jnp.dot(h, params["w3"].astype(jnp.bfloat16),
                     preferred_element_type=jnp.float32) + params["b3"]
    probs = jax.nn.softmax(logits, axis=1)
    if history_probs is not None:
        probs = 0.8 * probs + 0.2 * history_probs
    return probs


def _reference_f32_exact(params, x, history_probs=None):
    """Full-precision PyTorch-equivalent semantics (exact erf GELU)."""
    def gelu(v):
        return 0.5 * v * (1.0 + jax.lax.erf(v * _INV_SQRT2))

    def ln(v, g, b):
        mean = jnp.mean(v, -1, keepdims=True)
        var = jnp.mean((v - mean) ** 2, -1, keepdims=True)
        return (v - mean) * jax.lax.rsqrt(var + LN_EPS) * g + b

    h = gelu(ln(x @ params["w1"] + params["b1"], params["g1"], params["be1"]))
    h = gelu(ln(h @ params["w2"] + params["b2"], params["g2"], params["be2"]))
    logits = h @ params["w3"] + params["b3"]
    probs = jax.nn.softmax(logits, axis=1)
    if history_probs is not None:
        probs = 0.8 * probs + 0.2 * history_probs
    return probs


# ---------------------------------- main -------------------------------------

if __name__ == "__main__":
    key = jax.random.PRNGKey(0)
    k_param, k_x = jax.random.split(key)

    batch, input_size, hidden = 4, 32, 128   # hidden = module default (lane-aligned)
    params = init_params(k_param, input_size, hidden)
    x = jax.random.normal(k_x, (batch, input_size), jnp.float32)

    # First forward: no history_probs yet (hist-free kernel variant).
    probs1 = jax.block_until_ready(spatial_detector_forward(params, x, None))
    # Second forward: blends 0.8 * new + 0.2 * history (hist kernel variant).
    probs2 = jax.block_until_ready(spatial_detector_forward(params, x, probs1))

    ew = _elementwise_dtype()
    ref1 = _reference_matched(params, x, None, ew)
    ref2 = _reference_matched(params, x, probs1, ew)

    assert probs1.shape == (batch, 3) and probs2.shape == (batch, 3)
    assert jnp.allclose(probs1, ref1, atol=3e-2, rtol=3e-2)
    assert jnp.allclose(probs2, ref2, atol=3e-2, rtol=3e-2)
    # Outputs are valid probability distributions.
    assert jnp.allclose(jnp.sum(probs1, axis=1), 1.0, atol=1e-5)
    assert jnp.allclose(jnp.sum(probs2, axis=1), 1.0, atol=1e-5)
    # Loose sanity bound vs. exact-erf / f32 PyTorch semantics (tanh GELU +
    # bf16 MXU operands introduce small, documented deviations).
    assert jnp.allclose(probs1, _reference_f32_exact(params, x, None), atol=5e-2)

    print("KERNEL_OK")
</pallas_src>

<mosaic_0001>
module attributes {stable_mosaic.version = 11 : i64} {
  func.func @spatial_detector_kernel(%arg0: i32, %arg1: memref<16x32xf32, #tpu.memory_space<vmem>>, %arg2: memref<32x128xbf16, #tpu.memory_space<vmem>>, %arg3: memref<1x128xf32, #tpu.memory_space<vmem>>, %arg4: memref<1x128xf32, #tpu.memory_space<vmem>>, %arg5: memref<1x128xf32, #tpu.memory_space<vmem>>, %arg6: memref<128x128xbf16, #tpu.memory_space<vmem>>, %arg7: memref<1x128xf32, #tpu.memory_space<vmem>>, %arg8: memref<1x128xf32, #tpu.memory_space<vmem>>, %arg9: memref<1x128xf32, #tpu.memory_space<vmem>>, %arg10: memref<128x3xbf16, #tpu.memory_space<vmem>>, %arg11: memref<1x3xf32, #tpu.memory_space<vmem>>, %arg12: memref<16x3xf32, #tpu.memory_space<vmem>>) attributes {dimension_semantics = [#tpu.dimension_semantics<parallel>], iteration_bounds = array<i64: 1>, scalar_prefetch = 0 : i64, scratch_operands = 0 : i64, tpu.core_type = #tpu.core_type<tc>, window_params = [{transform_indices = @transform_0, window_bounds = array<i64: 16, 32>}, {pipeline_mode = #tpu.pipeline_mode<synchronous>, transform_indices = @transform_1, window_bounds = array<i64: 32, 128>}, {pipeline_mode = #tpu.pipeline_mode<synchronous>, transform_indices = @transform_2, window_bounds = array<i64: 1, 128>}, {pipeline_mode = #tpu.pipeline_mode<synchronous>, transform_indices = @transform_3, window_bounds = array<i64: 1, 128>}, {pipeline_mode = #tpu.pipeline_mode<synchronous>, transform_indices = @transform_4, window_bounds = array<i64: 1, 128>}, {pipeline_mode = #tpu.pipeline_mode<synchronous>, transform_indices = @transform_5, window_bounds = array<i64: 128, 128>}, {pipeline_mode = #tpu.pipeline_mode<synchronous>, transform_indices = @transform_6, window_bounds = array<i64: 1, 128>}, {pipeline_mode = #tpu.pipeline_mode<synchronous>, transform_indices = @transform_7, window_bounds = array<i64: 1, 128>}, {pipeline_mode = #tpu.pipeline_mode<synchronous>, transform_indices = @transform_8, window_bounds = array<i64: 1, 128>}, {pipeline_mode = #tpu.pipeline_mode<synchronous>, transform_indices = @transform_9, window_bounds = array<i64: 128, 3>}, {pipeline_mode = #tpu.pipeline_mode<synchronous>, transform_indices = @transform_10, window_bounds = array<i64: 1, 3>}, {transform_indices = @transform_11, window_bounds = array<i64: 16, 3>}]} {
    %c0 = arith.constant 0 : index
    %c0_0 = arith.constant 0 : index
    %0 = vector.load %arg1[%c0, %c0_0] : memref<16x32xf32, #tpu.memory_space<vmem>>, vector<16x32xf32>
    %1 = arith.truncf %0 : vector<16x32xf32> to vector<16x32xbf16>
    %c0_1 = arith.constant 0 : index
    %c0_2 = arith.constant 0 : index
    %2 = vector.load %arg2[%c0_1, %c0_2] : memref<32x128xbf16, #tpu.memory_space<vmem>>, vector<32x128xbf16>
    %cst = arith.constant dense<0.000000e+00> : vector<16x128xf32>
    %3 = tpu.matmul %1, %2, %cst {dimension_numbers = #tpu.dot_dimension_numbers<[1], [0], [0], [1], [0, 0, 1, 1], [], []>} : vector<16x32xbf16>, vector<32x128xbf16>, vector<16x128xf32> -> vector<16x128xf32>
    %c0_3 = arith.constant 0 : index
    %c0_4 = arith.constant 0 : index
    %4 = vector.load %arg3[%c0_3, %c0_4] : memref<1x128xf32, #tpu.memory_space<vmem>>, vector<1x128xf32>
    %5 = vector.broadcast %4 : vector<1x128xf32> to vector<16x128xf32>
    %6 = arith.addf %3, %5 : vector<16x128xf32>
    %c0_5 = arith.constant 0 : index
    %c0_6 = arith.constant 0 : index
    %7 = vector.load %arg4[%c0_5, %c0_6] : memref<1x128xf32, #tpu.memory_space<vmem>>, vector<1x128xf32>
    %c0_7 = arith.constant 0 : index
    %c0_8 = arith.constant 0 : index
    %8 = vector.load %arg5[%c0_7, %c0_8] : memref<1x128xf32, #tpu.memory_space<vmem>>, vector<1x128xf32>
    %cst_9 = arith.constant dense<0.000000e+00> : vector<16xf32>
    %9 = vector.multi_reduction <add>, %6, %cst_9 [1] : vector<16x128xf32> to vector<16xf32>
    %10 = vector.shape_cast %9 : vector<16xf32> to vector<16x1xf32>
    %11 = arith.mulf %6, %6 : vector<16x128xf32>
    %cst_10 = arith.constant dense<0.000000e+00> : vector<16xf32>
    %12 = vector.multi_reduction <add>, %11, %cst_10 [1] : vector<16x128xf32> to vector<16xf32>
    %13 = vector.shape_cast %12 : vector<16xf32> to vector<16x1xf32>
    %cst_11 = arith.constant 7.812500e-03 : f32
    %14 = vector.broadcast %cst_11 : f32 to vector<16x1xf32>
    %15 = arith.mulf %10, %14 : vector<16x1xf32>
    %cst_12 = arith.constant 7.812500e-03 : f32
    %16 = vector.broadcast %cst_12 : f32 to vector<16x1xf32>
    %17 = arith.mulf %13, %16 : vector<16x1xf32>
    %18 = arith.mulf %15, %15 : vector<16x1xf32>
    %19 = arith.subf %17, %18 : vector<16x1xf32>
    %cst_13 = arith.constant 0.000000e+00 : f32
    %20 = vector.broadcast %cst_13 : f32 to vector<16x1xf32>
    %21 = arith.maximumf %19, %20 : vector<16x1xf32>
    %cst_14 = arith.constant 9.99999974E-6 : f32
    %22 = vector.broadcast %cst_14 : f32 to vector<16x1xf32>
    %23 = arith.addf %21, %22 : vector<16x1xf32>
    %24 = math.rsqrt %23 : vector<16x1xf32>
    %25 = vector.broadcast %15 : vector<16x1xf32> to vector<16x128xf32>
    %26 = arith.subf %6, %25 : vector<16x128xf32>
    %27 = vector.broadcast %24 : vector<16x1xf32> to vector<16x128xf32>
    %28 = vector.broadcast %7 : vector<1x128xf32> to vector<16x128xf32>
    %29 = arith.mulf %27, %28 : vector<16x128xf32>
    %30 = arith.mulf %26, %29 : vector<16x128xf32>
    %31 = vector.broadcast %8 : vector<1x128xf32> to vector<16x128xf32>
    %32 = arith.addf %30, %31 : vector<16x128xf32>
    %33 = arith.mulf %32, %32 : vector<16x128xf32>
    %34 = arith.mulf %33, %32 : vector<16x128xf32>
    %cst_15 = arith.constant 5.000000e-01 : f32
    %35 = vector.broadcast %cst_15 : f32 to vector<16x128xf32>
    %36 = arith.mulf %35, %32 : vector<16x128xf32>
    %cst_16 = arith.constant 4.471500e-02 : f32
    %37 = vector.broadcast %cst_16 : f32 to vector<16x128xf32>
    %38 = arith.mulf %37, %34 : vector<16x128xf32>
    %39 = arith.addf %32, %38 : vector<16x128xf32>
    %cst_17 = arith.constant 0.797884583 : f32
    %40 = vector.broadcast %cst_17 : f32 to vector<16x128xf32>
    %41 = arith.mulf %40, %39 : vector<16x128xf32>
    %42 = math.tanh %41 : vector<16x128xf32>
    %cst_18 = arith.constant 1.000000e+00 : f32
    %43 = vector.broadcast %cst_18 : f32 to vector<16x128xf32>
    %44 = arith.addf %43, %42 : vector<16x128xf32>
    %45 = arith.mulf %36, %44 : vector<16x128xf32>
    %46 = arith.truncf %45 : vector<16x128xf32> to vector<16x128xbf16>
    %c0_19 = arith.constant 0 : index
    %c0_20 = arith.constant 0 : index
    %47 = vector.load %arg6[%c0_19, %c0_20] : memref<128x128xbf16, #tpu.memory_space<vmem>>, vector<128x128xbf16>
    %cst_21 = arith.constant dense<0.000000e+00> : vector<16x128xf32>
    %48 = tpu.matmul %46, %47, %cst_21 {dimension_numbers = #tpu.dot_dimension_numbers<[1], [0], [0], [1], [0, 0, 1, 1], [], []>} : vector<16x128xbf16>, vector<128x128xbf16>, vector<16x128xf32> -> vector<16x128xf32>
    %c0_22 = arith.constant 0 : index
    %c0_23 = arith.constant 0 : index
    %49 = vector.load %arg7[%c0_22, %c0_23] : memref<1x128xf32, #tpu.memory_space<vmem>>, vector<1x128xf32>
    %50 = vector.broadcast %49 : vector<1x128xf32> to vector<16x128xf32>
    %51 = arith.addf %48, %50 : vector<16x128xf32>
    %c0_24 = arith.constant 0 : index
    %c0_25 = arith.constant 0 : index
    %52 = vector.load %arg8[%c0_24, %c0_25] : memref<1x128xf32, #tpu.memory_space<vmem>>, vector<1x128xf32>
    %c0_26 = arith.constant 0 : index
    %c0_27 = arith.constant 0 : index
    %53 = vector.load %arg9[%c0_26, %c0_27] : memref<1x128xf32, #tpu.memory_space<vmem>>, vector<1x128xf32>
    %cst_28 = arith.constant dense<0.000000e+00> : vector<16xf32>
    %54 = vector.multi_reduction <add>, %51, %cst_28 [1] : vector<16x128xf32> to vector<16xf32>
    %55 = vector.shape_cast %54 : vector<16xf32> to vector<16x1xf32>
    %56 = arith.mulf %51, %51 : vector<16x128xf32>
    %cst_29 = arith.constant dense<0.000000e+00> : vector<16xf32>
    %57 = vector.multi_reduction <add>, %56, %cst_29 [1] : vector<16x128xf32> to vector<16xf32>
    %58 = vector.shape_cast %57 : vector<16xf32> to vector<16x1xf32>
    %cst_30 = arith.constant 7.812500e-03 : f32
    %59 = vector.broadcast %cst_30 : f32 to vector<16x1xf32>
    %60 = arith.mulf %55, %59 : vector<16x1xf32>
    %cst_31 = arith.constant 7.812500e-03 : f32
    %61 = vector.broadcast %cst_31 : f32 to vector<16x1xf32>
    %62 = arith.mulf %58, %61 : vector<16x1xf32>
    %63 = arith.mulf %60, %60 : vector<16x1xf32>
    %64 = arith.subf %62, %63 : vector<16x1xf32>
    %cst_32 = arith.constant 0.000000e+00 : f32
    %65 = vector.broadcast %cst_32 : f32 to vector<16x1xf32>
    %66 = arith.maximumf %64, %65 : vector<16x1xf32>
    %cst_33 = arith.constant 9.99999974E-6 : f32
    %67 = vector.broadcast %cst_33 : f32 to vector<16x1xf32>
    %68 = arith.addf %66, %67 : vector<16x1xf32>
    %69 = math.rsqrt %68 : vector<16x1xf32>
    %70 = vector.broadcast %60 : vector<16x1xf32> to vector<16x128xf32>
    %71 = arith.subf %51, %70 : vector<16x128xf32>
    %72 = vector.broadcast %69 : vector<16x1xf32> to vector<16x128xf32>
    %73 = vector.broadcast %52 : vector<1x128xf32> to vector<16x128xf32>
    %74 = arith.mulf %72, %73 : vector<16x128xf32>
    %75 = arith.mulf %71, %74 : vector<16x128xf32>
    %76 = vector.broadcast %53 : vector<1x128xf32> to vector<16x128xf32>
    %77 = arith.addf %75, %76 : vector<16x128xf32>
    %78 = arith.mulf %77, %77 : vector<16x128xf32>
    %79 = arith.mulf %78, %77 : vector<16x128xf32>
    %cst_34 = arith.constant 5.000000e-01 : f32
    %80 = vector.broadcast %cst_34 : f32 to vector<16x128xf32>
    %81 = arith.mulf %80, %77 : vector<16x128xf32>
    %cst_35 = arith.constant 4.471500e-02 : f32
    %82 = vector.broadcast %cst_35 : f32 to vector<16x128xf32>
    %83 = arith.mulf %82, %79 : vector<16x128xf32>
    %84 = arith.addf %77, %83 : vector<16x128xf32>
    %cst_36 = arith.constant 0.797884583 : f32
    %85 = vector.broadcast %cst_36 : f32 to vector<16x128xf32>
    %86 = arith.mulf %85, %84 : vector<16x128xf32>
    %87 = math.tanh %86 : vector<16x128xf32>
    %cst_37 = arith.constant 1.000000e+00 : f32
    %88 = vector.broadcast %cst_37 : f32 to vector<16x128xf32>
    %89 = arith.addf %88, %87 : vector<16x128xf32>
    %90 = arith.mulf %81, %89 : vector<16x128xf32>
    %91 = arith.truncf %90 : vector<16x128xf32> to vector<16x128xbf16>
    %c0_38 = arith.constant 0 : index
    %c0_39 = arith.constant 0 : index
    %92 = vector.load %arg10[%c0_38, %c0_39] : memref<128x3xbf16, #tpu.memory_space<vmem>>, vector<128x3xbf16>
    %cst_40 = arith.constant dense<0.000000e+00> : vector<16x3xf32>
    %93 = tpu.matmul %91, %92, %cst_40 {dimension_numbers = #tpu.dot_dimension_numbers<[1], [0], [0], [1], [0, 0, 1, 1], [], []>} : vector<16x128xbf16>, vector<128x3xbf16>, vector<16x3xf32> -> vector<16x3xf32>
    %c0_41 = arith.constant 0 : index
    %c0_42 = arith.constant 0 : index
    %94 = vector.load %arg11[%c0_41, %c0_42] : memref<1x3xf32, #tpu.memory_space<vmem>>, vector<1x3xf32>
    %95 = vector.broadcast %94 : vector<1x3xf32> to vector<16x3xf32>
    %96 = arith.addf %93, %95 : vector<16x3xf32>
    %cst_43 = arith.constant dense<0xFF800000> : vector<16xf32>
    %97 = vector.multi_reduction <maximumf>, %96, %cst_43 [1] : vector<16x3xf32> to vector<16xf32>
    %98 = vector.shape_cast %97 : vector<16xf32> to vector<16x1xf32>
    %99 = vector.broadcast %98 : vector<16x1xf32> to vector<16x3xf32>
    %100 = arith.subf %96, %99 : vector<16x3xf32>
    %101 = math.exp %100 : vector<16x3xf32>
    %cst_44 = arith.constant dense<0.000000e+00> : vector<16xf32>
    %102 = vector.multi_reduction <add>, %101, %cst_44 [1] : vector<16x3xf32> to vector<16xf32>
    %103 = vector.shape_cast %102 : vector<16xf32> to vector<16x1xf32>
    %104 = tpu.reciprocal %103 {approx = true} : vector<16x1xf32> -> vector<16x1xf32>
    %105 = arith.mulf %103, %104 : vector<16x1xf32>
    %cst_45 = arith.constant 2.000000e+00 : f32
    %106 = vector.broadcast %cst_45 : f32 to vector<16x1xf32>
    %107 = arith.subf %106, %105 : vector<16x1xf32>
    %108 = arith.mulf %104, %107 : vector<16x1xf32>
    %109 = vector.broadcast %108 : vector<16x1xf32> to vector<16x3xf32>
    %110 = arith.mulf %101, %109 : vector<16x3xf32>
    %c0_46 = arith.constant 0 : index
    %c0_47 = arith.constant 0 : index
    %111 = vector.load %arg12[%c0_46, %c0_47] : memref<16x3xf32, #tpu.memory_space<vmem>>, vector<16x3xf32>
    tpu.vector_store %arg12[%c0_46, %c0_47], %110 {strides = array<i32>} : memref<16x3xf32, #tpu.memory_space<vmem>>, vector<16x3xf32>,
    return
  }
  func.func @transform_0(%arg0: i32) -> (i32, i32) {
    %c0_i32 = arith.constant 0 : i32
    %c0_i32_0 = arith.constant 0 : i32
    return %arg0, %c0_i32 : i32, i32
  }
  func.func @transform_1(%arg0: i32) -> (i32, i32) {
    %c0_i32 = arith.constant 0 : i32
    %c0_i32_0 = arith.constant 0 : i32
    %c0_i32_1 = arith.constant 0 : i32
    return %c0_i32, %c0_i32_0 : i32, i32
  }
  func.func @transform_2(%arg0: i32) -> (i32, i32) {
    %c0_i32 = arith.constant 0 : i32
    %c0_i32_0 = arith.constant 0 : i32
    %c0_i32_1 = arith.constant 0 : i32
    return %c0_i32, %c0_i32_0 : i32, i32
  }
  func.func @transform_3(%arg0: i32) -> (i32, i32) {
    %c0_i32 = arith.constant 0 : i32
    %c0_i32_0 = arith.constant 0 : i32
    %c0_i32_1 = arith.constant 0 : i32
    return %c0_i32, %c0_i32_0 : i32, i32
  }
  func.func @transform_4(%arg0: i32) -> (i32, i32) {
    %c0_i32 = arith.constant 0 : i32
    %c0_i32_0 = arith.constant 0 : i32
    %c0_i32_1 = arith.constant 0 : i32
    return %c0_i32, %c0_i32_0 : i32, i32
  }
  func.func @transform_5(%arg0: i32) -> (i32, i32) {
    %c0_i32 = arith.constant 0 : i32
    %c0_i32_0 = arith.constant 0 : i32
    %c0_i32_1 = arith.constant 0 : i32
    return %c0_i32, %c0_i32_0 : i32, i32
  }
  func.func @transform_6(%arg0: i32) -> (i32, i32) {
    %c0_i32 = arith.constant 0 : i32
    %c0_i32_0 = arith.constant 0 : i32
    %c0_i32_1 = arith.constant 0 : i32
    return %c0_i32, %c0_i32_0 : i32, i32
  }
  func.func @transform_7(%arg0: i32) -> (i32, i32) {
    %c0_i32 = arith.constant 0 : i32
    %c0_i32_0 = arith.constant 0 : i32
    %c0_i32_1 = arith.constant 0 : i32
    return %c0_i32, %c0_i32_0 : i32, i32
  }
  func.func @transform_8(%arg0: i32) -> (i32, i32) {
    %c0_i32 = arith.constant 0 : i32
    %c0_i32_0 = arith.constant 0 : i32
    %c0_i32_1 = arith.constant 0 : i32
    return %c0_i32, %c0_i32_0 : i32, i32
  }
  func.func @transform_9(%arg0: i32) -> (i32, i32) {
    %c0_i32 = arith.constant 0 : i32
    %c0_i32_0 = arith.constant 0 : i32
    %c0_i32_1 = arith.constant 0 : i32
    return %c0_i32, %c0_i32_0 : i32, i32
  }
  func.func @transform_10(%arg0: i32) -> (i32, i32) {
    %c0_i32 = arith.constant 0 : i32
    %c0_i32_0 = arith.constant 0 : i32
    %c0_i32_1 = arith.constant 0 : i32
    return %c0_i32, %c0_i32_0 : i32, i32
  }
  func.func @transform_11(%arg0: i32) -> (i32, i32) {
    %c0_i32 = arith.constant 0 : i32
    %c0_i32_0 = arith.constant 0 : i32
    return %arg0, %c0_i32 : i32, i32
  }
}

</mosaic_0001>

<bundles_post_ra>
// kernel: tpu_custom_call.1
= control target key start
LH: loop header
LB: loop body
LE: loop exit
PB: predicated region body
PF: predicated region fallthrough
CT: control target
= control target key end

     0   :  { %16 = vsyncpa [#allocation3], 0  ;;  %s1003_s0 = inlined_call_operand.vmem [shape: f32[4,32], index: 0, kind: input, shape index: {}]   ;;  %s1004_s1 = inlined_call_operand.vmem [shape: bf16[32,128], index: 1, kind: input, shape index: {}]   ;;  %s1005_s2 = inlined_call_operand.hbm [shape: f32[1,128], index: 2, kind: input, shape index: {}]   ;;  %s1006_s3 = inlined_call_operand.hbm [shape: f32[1,128], index: 3, kind: input, shape index: {}]   ;;  %s1007_s4 = inlined_call_operand.hbm [shape: f32[1,128], index: 4, kind: input, shape index: {}]   ;;  %s1008_s5 = inlined_call_operand.vmem [shape: bf16[128,128], index: 5, kind: input, shape index: {}]   ;;  %s1009_s6 = inlined_call_operand.vmem [shape: f32[1,128], index: 6, kind: input, shape index: {}]   ;;  %s1010_s7 = inlined_call_operand.vmem [shape: f32[1,128], index: 7, kind: input, shape index: {}]   ;;  %s1011_s8 = inlined_call_operand.vmem [shape: f32[1,128], index: 8, kind: input, shape index: {}]   ;;  %s1012_s9 = inlined_call_operand.vmem [shape: bf16[128,3], index: 9, kind: input, shape index: {}]   ;;  %s1013_s10 = inlined_call_operand.vmem [shape: f32[1,3], index: 10, kind: input, shape index: {}]   ;;  %s1014_s11 = inlined_call_operand.hbm [shape: f32[4,3], index: 11, kind: output, shape index: {}]  }
   0x1   :  { %17 = vsyncpa [#allocation6], 0 }
   0x2   :  { %18 = vsyncpa [#allocation4], 0  ;;  %s788_s17 = smov [#allocation5]   ;;  %s789_s19 = smov [#allocation2]  }
   0x3   :  { %s39_s18 = sshll.u32 %s788_s17, 4  ;;  %s29_s20 = sshll.u32 %s789_s19, 4  ;;  %s40_s18 = int_to_ptr.vmem [resolvable:$true] %s39_s18  ;;  %s30_s20 = int_to_ptr.vmem [resolvable:$true] %s29_s20 }
   0x4   :  { %s694_s23 = scalar_lea.hbm %s1006_s3, 16 }
   0x5   :  { %p695_p0 = scmp.ne.s32.totalorder %s1006_s3, %s694_s23  ;;  %p698_p1 = scmp.lt.u32.totalorder %s694_s23, %s1006_s3 }
   0x7   :  { %p700_p2 = pnand %p698_p1, %p695_p0 }
   0x9   :  { %703 = shalt.err (!%p700_p2)
}
   0xa   :  { %s704_s28 = scalar_lea.vmem %s40_s18, 16  ;;  %s708_s29 = scalar_lea.vmem %s40_s18, 32 }
   0xb   :  { %p705_p3 = scmp.ne.s32.totalorder %s40_s18, %s704_s28  ;;  %p709_p4 = scmp.lt.s32.totalorder %s40_s18, %s40_s18 }
   0xc   :  { %p710_p5 = scmp.lt.s32.totalorder %s708_s29, %s704_s28 }
   0xe   :  { %p711_p6 = por %p710_p5, %p709_p4 }
  0x10   :  { %p712_p7 = pnand %p711_p6, %p705_p3 }
  0x12   :  { %715 = shalt.err (!%p712_p7)
}
  0x13   :  { %42 = dma.hbm_to_vmem [thread:$0]  %s1006_s3, 16, %s40_s18, [#allocation6]  }
  0x14   :  { %s716_s15 = scalar_lea.hbm %s1005_s2, 16 }
  0x15   :  { %p717_p8 = scmp.ne.s32.totalorder %s1005_s2, %s716_s15  ;;  %p720_p9 = scmp.lt.u32.totalorder %s716_s15, %s1005_s2 }
  0x17   :  { %p722_p10 = pnand %p720_p9, %p717_p8 }
  0x19   :  { %725 = shalt.err (!%p722_p10)
}
  0x1a   :  { %s726_s22 = scalar_lea.vmem %s30_s20, 16  ;;  %s730_s23 = scalar_lea.vmem %s30_s20, 32 }
  0x1b   :  { %p727_p11 = scmp.ne.s32.totalorder %s30_s20, %s726_s22  ;;  %p731_p12 = scmp.lt.s32.totalorder %s30_s20, %s30_s20 }
  0x1c   :  { %p732_p13 = scmp.lt.s32.totalorder %s730_s23, %s726_s22 }
  0x1e   :  { %p733_p0 = por %p732_p13, %p731_p12 }
  0x20   :  { %p734_p1 = pnand %p733_p0, %p727_p11 }
  0x22   :  { %737 = shalt.err (!%p734_p1)
}
  0x23   :  { %32 = dma.hbm_to_vmem [thread:$0]  %s1005_s2, 16, %s30_s20, [#allocation3]  }
  0x24   :  { %s790_s24 = smov [#allocation7]   ;;  %s738_s28 = scalar_lea.hbm %s1007_s4, 16 }
  0x25   :  { %s49_s25 = sshll.u32 %s790_s24, 4  ;;  %p739_p2 = scmp.ne.s32.totalorder %s1007_s4, %s738_s28  ;;  %s50_s25 = int_to_ptr.vmem [resolvable:$true] %s49_s25 }
  0x26   :  { %p742_p3 = scmp.lt.u32.totalorder %s738_s28, %s1007_s4 }
  0x28   :  { %p744_p4 = pnand %p742_p3, %p739_p2 }
  0x2a   :  { %747 = shalt.err (!%p744_p4)
}
  0x2b   :  { %s748_s14 = scalar_lea.vmem %s50_s25, 16  ;;  %s752_s2 = scalar_lea.vmem %s50_s25, 32 }
  0x2c   :  { %p749_p5 = scmp.ne.s32.totalorder %s50_s25, %s748_s14  ;;  %p753_p6 = scmp.lt.s32.totalorder %s50_s25, %s50_s25 }
  0x2d   :  { %p754_p7 = scmp.lt.s32.totalorder %s752_s2, %s748_s14 }
  0x2f   :  { %p755_p8 = por %p754_p7, %p753_p6 }
  0x31   :  { %p756_p9 = pnand %p755_p8, %p749_p5 }
  0x33   :  { %759 = shalt.err (!%p756_p9)
}
  0x34   :  { %52 = dma.hbm_to_vmem [thread:$0]  %s1007_s4, 16, %s50_s25, [#allocation6]  }
  0x35   :  { %782 = dma.done.wait [#allocation3], 16  }
  0x36   :  { %783 = vsyncadd [#allocation3], 4294967280 }
  0x37   :  { %784 = dma.done.wait [#allocation6], 32  }
  0x38   :  { %785 = vsyncadd [#allocation6], 4294967264  ;;  %v791_v0 = vmov 0.0   ;;  %vm792_vm0 = vmmov 0   ;;  %v652_v1 = vld [vmem:[%s1004_s1] sm:$0xff]   ;;  %v653_v2 = vld [vmem:[%s1004_s1 + $0x8] sm:$0xff]  }
  0x39   :  { %596 = vmatprep.subr.bf16.mxu0 %v791_v0  ;;  %600 = vmatprep.mubr.msk.bf16.mxu0 %vm792_vm0, %v791_v0  ;;  %v75_v3 = vld [vmem:[%s1003_s0] sm:$0xff]  ;;  %v76_v4 = vld [vmem:[%s1003_s0 + $0x8] sm:$0xff]  ;;  %vm101_vm1 = vcmask 261120   ;;  %v656_v17 = vld [vmem:[%s1008_s5 + $0x10] sm:$0xff]   ;;  %vm500_vm2 = vcmask 23552  }
  0x3a   :  { %604 = vmatprep.subr.bf16.mxu1 %v791_v0  ;;  %620 = vmatprep.mubr.msk.bf16.mxu1 %vm792_vm0, %v791_v0  ;;  %v77_v5 = vpack.c.bf16 %v76_v4, %v75_v3  ;;  %v549_v6 = vld [vmem:[#allocation2] ss:$0 sm:$0xff]  ;;  %v655_v16 = vld [vmem:[%s1008_s5 + $0x8] sm:$0xff]   ;;  %v657_v18 = vld [vmem:[%s1008_s5 + $0x18] sm:$0xff]  }
  0x3b   :  { %597 = vmatpush3.bf16.msra.mxu0 %v652_v1  ;;  %v654_v15 = vld [vmem:[%s1008_s5] sm:$0xff]   ;;  %v659_v20 = vld [vmem:[%s1008_s5 + $0x28] sm:$0xff]   ;;  %v660_v21 = vld [vmem:[%s1008_s5 + $0x30] sm:$0xff]  }
  0x3c   :  { %598 = vmatprep.subr.bf16.mxu0 %v791_v0  ;;  %605 = vmatpush3.bf16.msra.mxu1 %v654_v15  ;;  %v658_v19 = vld [vmem:[%s1008_s5 + $0x20] sm:$0xff]   ;;  %v661_v22 = vld [vmem:[%s1008_s5 + $0x38] sm:$0xff]  }
  0x3d   :  { %606 = vmatprep.subr.bf16.mxu1 %v791_v0  ;;  %v553_v39 = vld [vmem:[#allocation5] ss:$0 sm:$0xff]  ;;  %v554_v43 = vld [vmem:[#allocation7] ss:$0 sm:$0xff] }
  0x3f   :  { %599 = vmatpush3.bf16.msra.mxu0 %v653_v2 }
  0x40   :  { %624 = vmatprep.subr.bf16.mxu0 %v791_v0  ;;  %607 = vmatpush3.bf16.msra.mxu1 %v655_v16  ;;  %v662_v16 = vld [vmem:[%s1012_s9] sm:$0xff]  }
  0x41   :  { %608 = vmatprep.subr.bf16.mxu1 %v791_v0 }
  0x42   :  { %601 = vmatmul.mubr.msk.bf16.vlgmr.msra.gmra.mrb[0].mxu0 %vm101_vm1, %v77_v5 }
  0x43   :  { %640 = vmatprep.mubr.msk.bf16.mxu0 %vm792_vm0, %v791_v0  ;;  %625 = vmatpush3.bf16.msra.mxu0 %v662_v16 }
  0x44   :  { %609 = vmatpush3.bf16.msra.mxu1 %v656_v17  ;;  %626 = vmatprep.subr.bf16.mxu0 %v791_v0  ;;  %v663_v17 = vld [vmem:[%s1012_s9 + $0x8] sm:$0xff]  }
  0x45   :  { %610 = vmatprep.subr.bf16.mxu1 %v791_v0 }
  0x47   :  { %627 = vmatpush3.bf16.msra.mxu0 %v663_v17 }
  0x48   :  { %611 = vmatpush3.bf16.msra.mxu1 %v657_v18  ;;  %v664_v18 = vld [vmem:[%s1012_s9 + $0x10] sm:$0xff]   ;;  %628 = vmatprep.subr.bf16.mxu0 %v791_v0 }
  0x49   :  { %612 = vmatprep.subr.bf16.mxu1 %v791_v0 }
  0x4b   :  { %629 = vmatpush3.bf16.msra.mxu0 %v664_v18 }
  0x4c   :  { %613 = vmatpush3.bf16.msra.mxu1 %v658_v19  ;;  %v665_v19 = vld [vmem:[%s1012_s9 + $0x18] sm:$0xff]   ;;  %630 = vmatprep.subr.bf16.mxu0 %v791_v0 }
  0x4d   :  { %614 = vmatprep.subr.bf16.mxu1 %v791_v0 }
  0x4f   :  { %631 = vmatpush3.bf16.msra.mxu0 %v665_v19 }
  0x50   :  { %615 = vmatpush3.bf16.msra.mxu1 %v659_v20  ;;  %v666_v20 = vld [vmem:[%s1012_s9 + $0x20] sm:$0xff]   ;;  %632 = vmatprep.subr.bf16.mxu0 %v791_v0 }
  0x51   :  { %616 = vmatprep.subr.bf16.mxu1 %v791_v0 }
  0x53   :  { %633 = vmatpush3.bf16.msra.mxu0 %v666_v20 }
  0x54   :  { %617 = vmatpush3.bf16.msra.mxu1 %v660_v21  ;;  %v667_v21 = vld [vmem:[%s1012_s9 + $0x28] sm:$0xff]   ;;  %634 = vmatprep.subr.bf16.mxu0 %v791_v0 }
  0x55   :  { %618 = vmatprep.subr.bf16.mxu1 %v791_v0 }
  0x57   :  { %635 = vmatpush3.bf16.msra.mxu0 %v667_v21 }
  0x58   :  { %619 = vmatpush3.bf16.msra.mxu1 %v661_v22  ;;  %v668_v22 = vld [vmem:[%s1012_s9 + $0x30] sm:$0xff]   ;;  %636 = vmatprep.subr.bf16.mxu0 %v791_v0 }
  0x5b   :  { %637 = vmatpush3.bf16.msra.mxu0 %v668_v22 }
  0x5c   :  { %638 = vmatprep.subr.bf16.mxu0 %v791_v0  ;;  %v564_v0 = vld [vmem:[%s1010_s7] ss:$0 sm:$0xff] }
 0x115   :  { %v139_v7 = vpop.f32.mrb[0].mxu0 }
 0x116   :  { %v140_v8 = vadd.f32 %v549_v6, %v139_v7  ;;  %v602_v9 = vpop.f32.mrb[1].mxu0  ;;  %v555_v7 = vld [vmem:[%s1009_s6] ss:$0 sm:$0xff] }
 0x117   :  { %v142_v10 = vpop.f32.mrb[2].mxu0 }
 0x118   :  { %v143_v11 = vadd.f32 %v549_v6, %v142_v10  ;;  %148 = vadd.xlane.f32.xlu0 %v140_v8  ;;  %v603_v12 = vpop.f32.mrb[3].mxu0  ;;  %v152_v13 = vmul.f32 %v140_v8, %v140_v8 }
 0x11a   :  { %154 = vadd.xlane.f32.xlu1 %v152_v13  ;;  %v153_v14 = vmul.f32 %v143_v11, %v143_v11 }
 0x11c   :  { %150 = vadd.xlane.f32.xlu0 %v143_v11 }
 0x11e   :  { %156 = vadd.xlane.f32.xlu1 %v153_v14 }
 0x1a5   :  { %v149_v23 = vpop.xlane.xlu0 %148 }
 0x1a6   :  { %v158_v24 = vmul.f32 0.0078125, %v149_v23  ;;  %v669_v23 = vld [vmem:[%s1012_s9 + $0x38] sm:$0xff]  }
 0x1a7   :  { %v155_v25 = vpop.xlane.xlu1 %154  ;;  %639 = vmatpush3.bf16.msra.mxu0 %v669_v23 }
 0x1a8   :  { %v162_v26 = vmul.f32 %v158_v24, %v158_v24  ;;  %v160_v27 = vmul.f32 0.0078125, %v155_v25  ;;  %v172_v41 = vsub.f32 %v140_v8, %v158_v24 }
 0x1a9   :  { %v151_v28 = vpop.xlane.xlu0 %150 }
 0x1aa   :  { %v164_v29 = vsub.f32 %v160_v27, %v162_v26  ;;  %v159_v30 = vmul.f32 0.0078125, %v151_v28 }
 0x1ab   :  { %v157_v31 = vpop.xlane.xlu1 %156 }
 0x1ac   :  { %v166_v32 = vmax.f32 %v164_v29, 0.0  ;;  %v163_v33 = vmul.f32 %v159_v30, %v159_v30  ;;  %v161_v34 = vmul.f32 0.0078125, %v157_v31  ;;  %v173_v46 = vsub.f32 %v143_v11, %v159_v30 }
 0x1ae   :  { %v168_v35 = vadd.f32 1e-05, %v166_v32  ;;  %v165_v36 = vsub.f32 %v161_v34, %v163_v33 }
 0x1b0   :  { %670 = vrsqrt.f32 %v168_v35  ;;  %v167_v37 = vmax.f32 %v165_v36, 0.0 }
 0x1b2   :  { %v169_v38 = vadd.f32 1e-05, %v167_v37 }
 0x1b4   :  { %672 = vrsqrt.f32 %v169_v38 }
 0x1ba   :  { %v671_v40 = vpop.eup %670 }
 0x1bb   :  { %v180_v42 = vmul.f32 %v671_v40, %v553_v39 }
 0x1bd   :  { %v182_v44 = vmul.f32 %v180_v42, %v172_v41 }
 0x1be   :  { %v673_v45 = vpop.eup %672 }
 0x1bf   :  { %v181_v47 = vmul.f32 %v673_v45, %v553_v39  ;;  %v190_v48 = vadd.f32 %v554_v43, %v182_v44  ;;  %v565_v44 = vld [vmem:[%s1011_s8] ss:$0 sm:$0xff] }
 0x1c1   :  { %v183_v49 = vmul.f32 %v181_v47, %v173_v46  ;;  %v192_v50 = vmul.f32 %v190_v48, %v190_v48  ;;  %v196_v1 = vmul.f32 0.5, %v190_v48 }
 0x1c3   :  { %v191_v51 = vadd.f32 %v554_v43, %v183_v49  ;;  %v194_v52 = vmul.f32 %v192_v50, %v190_v48 }
 0x1c5   :  { %v193_v53 = vmul.f32 %v191_v51, %v191_v51  ;;  %v198_v54 = vmul.f32 0.044715, %v194_v52  ;;  %v197_v2 = vmul.f32 0.5, %v191_v51 }
 0x1c7   :  { %v195_v55 = vmul.f32 %v193_v53, %v191_v51  ;;  %v200_v56 = vadd.f32 %v198_v54, %v190_v48 }
 0x1c9   :  { %v199_v57 = vmul.f32 0.044715, %v195_v55  ;;  %v202_v58 = vmul.f32 0.7978846, %v200_v56 }
 0x1cb   :  { %v201_v59 = vadd.f32 %v199_v57, %v191_v51  ;;  %674 = vtanh.f32 %v202_v58 }
 0x1cd   :  { %v203_v60 = vmul.f32 0.7978846, %v201_v59 }
 0x1cf   :  { %676 = vtanh.f32 %v203_v60 }
 0x1d5   :  { %v675_v61 = vpop.eup %674 }
 0x1d6   :  { %v206_v62 = vadd.f32 1.0, %v675_v61 }
 0x1d8   :  { %v208_v4 = vmul.f32 %v206_v62, %v196_v1 }
 0x1d9   :  { %v677_v63 = vpop.eup %676 }
 0x1da   :  { %v207_v3 = vadd.f32 1.0, %v677_v63 }
 0x1dc   :  { %v209_v5 = vmul.f32 %v207_v3, %v197_v2 }
 0x1de   :  { %v210_v6 = vpack.c.bf16 %v209_v5, %v208_v4 }
 0x1e0   :  { %621 = vmatmul.mubr.bf16.vlgmr.msra.gmra.mrb[0].mxu1 %v210_v6 }
 0x2b3   :  { %v316_v8 = vpop.f32.mrb[0].mxu1 }
 0x2b4   :  { %v317_v9 = vadd.f32 %v555_v7, %v316_v8  ;;  %v622_v10 = vpop.f32.mrb[1].mxu1 }
 0x2b5   :  { %v319_v11 = vpop.f32.mrb[2].mxu1 }
 0x2b6   :  { %v320_v12 = vadd.f32 %v555_v7, %v319_v11  ;;  %325 = vadd.xlane.f32.xlu0 %v317_v9  ;;  %v623_v13 = vpop.f32.mrb[3].mxu1  ;;  %v329_v14 = vmul.f32 %v317_v9, %v317_v9  ;;  %v566_v7 = vld [vmem:[%s1013_s10] ss:$0 sm:$0xff] }
 0x2b8   :  { %327 = vadd.xlane.f32.xlu1 %v320_v12  ;;  %v330_v15 = vmul.f32 %v320_v12, %v320_v12 }
 0x2ba   :  { %331 = vadd.xlane.f32.xlu0 %v329_v14 }
 0x2bc   :  { %333 = vadd.xlane.f32.xlu1 %v330_v15 }
 0x343   :  { %v326_v24 = vpop.xlane.xlu0 %325 }
 0x344   :  { %v335_v25 = vmul.f32 0.0078125, %v326_v24 }
 0x345   :  { %v328_v26 = vpop.xlane.xlu1 %327 }
 0x346   :  { %v336_v27 = vmul.f32 0.0078125, %v328_v26  ;;  %v339_v29 = vmul.f32 %v335_v25, %v335_v25  ;;  %v349_v41 = vsub.f32 %v317_v9, %v335_v25 }
 0x347   :  { %v332_v28 = vpop.xlane.xlu0 %331 }
 0x348   :  { %v337_v30 = vmul.f32 0.0078125, %v332_v28  ;;  %v340_v32 = vmul.f32 %v336_v27, %v336_v27  ;;  %v350_v45 = vsub.f32 %v320_v12, %v336_v27 }
 0x349   :  { %v334_v31 = vpop.xlane.xlu1 %333 }
 0x34a   :  { %v341_v33 = vsub.f32 %v337_v30, %v339_v29  ;;  %v338_v34 = vmul.f32 0.0078125, %v334_v31 }
 0x34c   :  { %v343_v35 = vmax.f32 %v341_v33, 0.0  ;;  %v342_v36 = vsub.f32 %v338_v34, %v340_v32 }
 0x34e   :  { %v345_v37 = vadd.f32 1e-05, %v343_v35  ;;  %v344_v38 = vmax.f32 %v342_v36, 0.0 }
 0x350   :  { %678 = vrsqrt.f32 %v345_v37  ;;  %v346_v39 = vadd.f32 1e-05, %v344_v38 }
 0x352   :  { %680 = vrsqrt.f32 %v346_v39 }
 0x35a   :  { %v679_v40 = vpop.eup %678 }
 0x35b   :  { %v357_v42 = vmul.f32 %v679_v40, %v564_v0 }
 0x35c   :  { %v681_v43 = vpop.eup %680 }
 0x35d   :  { %v359_v46 = vmul.f32 %v357_v42, %v349_v41  ;;  %v358_v47 = vmul.f32 %v681_v43, %v564_v0 }
 0x35f   :  { %v367_v48 = vadd.f32 %v565_v44, %v359_v46  ;;  %v360_v49 = vmul.f32 %v358_v47, %v350_v45 }
 0x361   :  { %v368_v50 = vadd.f32 %v565_v44, %v360_v49  ;;  %v369_v51 = vmul.f32 %v367_v48, %v367_v48  ;;  %v373_v1 = vmul.f32 0.5, %v367_v48 }
 0x363   :  { %v370_v52 = vmul.f32 %v368_v50, %v368_v50  ;;  %v371_v53 = vmul.f32 %v369_v51, %v367_v48  ;;  %v374_v2 = vmul.f32 0.5, %v368_v50 }
 0x365   :  { %v372_v54 = vmul.f32 %v370_v52, %v368_v50  ;;  %v375_v55 = vmul.f32 0.044715, %v371_v53 }
 0x367   :  { %v376_v56 = vmul.f32 0.044715, %v372_v54  ;;  %v377_v57 = vadd.f32 %v375_v55, %v367_v48 }
 0x369   :  { %v378_v58 = vadd.f32 %v376_v56, %v368_v50  ;;  %v379_v59 = vmul.f32 0.7978846, %v377_v57 }
 0x36b   :  { %v380_v60 = vmul.f32 0.7978846, %v378_v58  ;;  %682 = vtanh.f32 %v379_v59 }
 0x36d   :  { %684 = vtanh.f32 %v380_v60 }
 0x375   :  { %v683_v61 = vpop.eup %682 }
 0x376   :  { %v383_v62 = vadd.f32 1.0, %v683_v61 }
 0x377   :  { %v685_v63 = vpop.eup %684 }
 0x378   :  { %v384_v3 = vadd.f32 1.0, %v685_v63  ;;  %v385_v4 = vmul.f32 %v383_v62, %v373_v1 }
 0x37a   :  { %v386_v5 = vmul.f32 %v384_v3, %v374_v2 }
 0x37c   :  { %v387_v6 = vpack.c.bf16 %v386_v5, %v385_v4 }
 0x37e   :  { %641 = vmatmul.mubr.bf16.vlgmr.msra.gmra.mrb[4].mxu0 %v387_v6 }
 0x451   :  { %v493_v8 = vpop.f32.mrb[4].mxu0 }
 0x452   :  { %v494_v9 = vadd.f32 %v566_v7, %v493_v8  ;;  %v642_v10 = vpop.f32.mrb[5].mxu0 }
 0x453   :  { %v496_v11 = vpop.f32.mrb[6].mxu0 }
 0x454   :  { %v497_v12 = vadd.f32 %v566_v7, %v496_v11  ;;  %v643_v13 = vpop.f32.mrb[7].mxu0  ;;  %v501_v14 = vsel %vm500_vm2, %v494_v9, -inf }
 0x455   :  { %502 = vmax.xlane.f32.xlu0 %v501_v14 }
 0x456   :  { %v504_v15 = vsel %vm500_vm2, %v497_v12, -inf }
 0x457   :  { %505 = vmax.xlane.f32.xlu1 %v504_v15 }
 0x4e2   :  { %v503_v16 = vpop.xlane.xlu0 %502 }
 0x4e3   :  { %v507_v17 = vsub.f32 %v494_v9, %v503_v16 }
 0x4e4   :  { %v506_v18 = vpop.xlane.xlu1 %505 }
 0x4e5   :  { %v509_v19 = vmul.f32 1.442695, %v507_v17  ;;  %v508_v20 = vsub.f32 %v497_v12, %v506_v18 }
 0x4e7   :  { %686 = vpow2.f32 %v509_v19  ;;  %v511_v21 = vmul.f32 1.442695, %v508_v20 }
 0x4e9   :  { %688 = vpow2.f32 %v511_v21 }
 0x4f1   :  { %v687_v22 = vpop.eup %686 }
 0x4f2   :  { %v513_v23 = vsel %vm500_vm2, %v687_v22, 0.0 }
 0x4f3   :  { %v689_v24 = vpop.eup %688  ;;  %514 = vadd.xlane.f32.xlu0 %v513_v23 }
 0x4f4   :  { %v516_v25 = vsel %vm500_vm2, %v689_v24, 0.0 }
 0x4f5   :  { %517 = vadd.xlane.f32.xlu1 %v516_v25 }
 0x580   :  { %v515_v26 = vpop.xlane.xlu0 %514 }
 0x581   :  { %690 = vrcp.f32 %v515_v26 }
 0x582   :  { %v518_v27 = vpop.xlane.xlu1 %517 }
 0x583   :  { %692 = vrcp.f32 %v518_v27 }
 0x58b   :  { %v691_v28 = vpop.eup %690 }
 0x58c   :  { %v521_v29 = vmul.f32 %v691_v28, %v515_v26 }
 0x58d   :  { %v693_v30 = vpop.eup %692 }
 0x58e   :  { %v523_v31 = vsub.f32 2.0, %v521_v29  ;;  %v522_v32 = vmul.f32 %v693_v30, %v518_v27 }
 0x590   :  { %v525_v33 = vmul.f32 %v691_v28, %v523_v31  ;;  %v524_v34 = vsub.f32 2.0, %v522_v32 }
 0x592   :  { %v527_v35 = vmul.f32 %v687_v22, %v525_v33  ;;  %v526_v36 = vmul.f32 %v693_v30, %v524_v34 }
 0x594   :  { %529 = vst.msk [vmem:[#allocation8] sm:$0xff] %vm500_vm2, %v527_v35  ;;  %v528_v37 = vmul.f32 %v689_v24, %v526_v36 }
 0x596   :  { %530 = vst.msk [vmem:[#allocation8 + $0x8] sm:$0xff] %vm500_vm2, %v528_v37 }
 0x597   :  { %535 = vsyncadd [#allocation4], 192  ;;  %s793_s10 = smov [#allocation8]  }
 0x598   :  { %s536_s13 = sshll.u32 %s793_s10, 4  ;;  %s537_s13 = int_to_ptr.vmem [resolvable:$true] %s536_s13 }
 0x599   :  { %s760_s14 = scalar_lea.vmem %s537_s13, 64  ;;  %s764_s2 = scalar_lea.vmem %s537_s13, 256 }
 0x59a   :  { %p761_p10 = scmp.ne.s32.totalorder %s537_s13, %s760_s14  ;;  %p765_p11 = scmp.lt.s32.totalorder %s537_s13, %s537_s13 }
 0x59b   :  { %p766_p12 = scmp.lt.s32.totalorder %s764_s2, %s760_s14 }
 0x59d   :  { %p767_p13 = por %p766_p12, %p765_p11 }
 0x59f   :  { %p768_p0 = pnand %p767_p13, %p761_p10 }
 0x5a1   :  { %771 = shalt.err (!%p768_p0)
}
 0x5a2   :  { %s772_s5 = scalar_lea.hbm %s1014_s11, 64 }
 0x5a3   :  { %p773_p1 = scmp.ne.s32.totalorder %s1014_s11, %s772_s5  ;;  %p776_p2 = scmp.lt.u32.totalorder %s772_s5, %s1014_s11 }
 0x5a5   :  { %p778_p3 = pnand %p776_p2, %p773_p1 }
 0x5a7   :  { %781 = shalt.err (!%p778_p3)
}
 0x5a8   :  { %s794_s19 = smov 64   ;;  %s795_s21 = smov 4  }
 0x5a9   :  { %542 = dma.vmem_to_hbm [thread:$0]  %s537_s13, 64, %s1014_s11, [#allocation4], %s794_s19, %s794_s19, %s795_s21  }
 0x5aa   :  { %786 = dma.done.wait [#allocation4], 256  }
 0x5ab   :  { %787 = vsyncadd [#allocation4], 4294967040 }
 0x5ac   :  { %546 = vsyncpa [#allocation3], 1 }
 0x5ad   :  { %547 = vsyncpa [#allocation6], 1 }
 0x5ae   :  { %548 = vsyncpa [#allocation4], 1 }

</bundles_post_ra>
